<compile_context>
chip_gen: v7x
topology: tpu7x:2x2x1
jax: 0.10.0
libtpu: 0.0.40
codegen_flags: <defaults>
</compile_context>

<pallas_src>
import functools

import jax
import jax.numpy as jnp
from jax.experimental import pallas as pl
from jax.experimental.pallas import tpu as pltpu


def _make_kernel(num_layers: int, chunk: int, num_chunks: int):
    """Kernel body for a fixed (static) number of 1x1-conv layers.

    Refs: (x_ref, w0, b0, w1, b1, ..., o_ref)
      x_ref : (C_in,  tile_hw)   pixels on lanes, channels on sublanes
      w_i   : (C_out, C_in)      native PyTorch conv weight layout (1x1 squeezed)
      b_i   : (C_out, 1)
      o_ref : (C_out_last, tile_hw)
    """

    def kernel(*refs):
        x_ref = refs[0]
        o_ref = refs[-1]
        param_refs = refs[1:-1]
        assert len(param_refs) == 2 * num_layers

        # Tiny weights/biases: load once per grid step.
        ws = [param_refs[2 * i][...].astype(jnp.float32) for i in range(num_layers)]
        bs = [param_refs[2 * i + 1][...].astype(jnp.float32) for i in range(num_layers)]

        def chain(h):
            # h: (C, lanes) f32
            for li in range(num_layers):
                h = jnp.dot(ws[li], h, preferred_element_type=jnp.float32) + bs[li]
                if li < num_layers - 1:  # LeakyReLU(0.2) on all but the final conv
                    h = jnp.where(h > 0, h, 0.2 * h)
            return h

        if num_chunks == 1:
            o_ref[...] = chain(x_ref[...].astype(jnp.float32)).astype(o_ref.dtype)
        else:
            # Strip-mine the lane axis so every layer's live value stays small
            # (fits the register file / avoids large VMEM intermediates).
            def body(ci, carry):
                start = pl.multiple_of(ci * chunk, chunk)
                h = chain(x_ref[:, pl.ds(start, chunk)].astype(jnp.float32))
                o_ref[:, pl.ds(start, chunk)] = h.astype(o_ref.dtype)
                return carry

            jax.lax.fori_loop(0, num_chunks, body, 0, unroll=True)

    return kernel


def init_color_reconstruction_params(key, ndf, nDep, nc=3):
    """Parameter init matching PyTorch layer shapes.

    Conv2d(of, nf, 1) weight is (nf, of, 1, 1); we keep it as (nf, of) = (C_out, C_in)
    and bias as (C_out, 1). PyTorch default init is kaiming_uniform(a=sqrt(5))
    => U(-1/sqrt(fan_in), 1/sqrt(fan_in)).
    """
    dims = []
    of = nc
    for i in range(nDep):
        nf = ndf * 2 ** i
        dims.append((of, nf))
        of = nf
    dims.append((of, nc))  # final conv back to nc channels

    params = []
    for (cin, cout) in dims:
        key, kw, kb = jax.random.split(key, 3)
        bound = 1.0 / jnp.sqrt(jnp.float32(cin))
        w = jax.random.uniform(kw, (cout, cin), jnp.float32, -bound, bound)
        b = jax.random.uniform(kb, (cout, 1), jnp.float32, -bound, bound)
        params.append((w, b))
    return params


@functools.partial(jax.jit, static_argnames=("tile_hw", "chunk"))
def color_reconstruction_pallas(x_nchw, params, tile_hw=16384, chunk=2048):
    """Forward pass of ColorReconstruction. x_nchw: (N, nc, H, W)."""
    N, C, H, W = x_nchw.shape
    HW = H * W
    nc_out = params[-1][0].shape[0]

    # Clamp the tile / chunk sizes to the problem size (all static ints).
    tile_hw = min(tile_hw, HW)
    chunk = min(chunk, tile_hw)
    assert HW % 128 == 0, "H*W must be a multiple of 128 (lane width)"
    assert HW % tile_hw == 0 and tile_hw % chunk == 0 and chunk % 128 == 0
    num_chunks = tile_hw // chunk

    # Free view: NCHW -> (N, C, H*W). Pixels land on the lane axis.
    x3d = x_nchw.reshape(N, C, HW)

    in_specs = [pl.BlockSpec((None, C, tile_hw), lambda n, j: (n, 0, j))]
    args = [x3d]
    for (w, b) in params:
        in_specs.append(pl.BlockSpec(w.shape, lambda n, j: (0, 0)))
        in_specs.append(pl.BlockSpec(b.shape, lambda n, j: (0, 0)))
        args.append(w)
        args.append(b)

    # Advisory cost: memory-bound (tiny channel matmuls).
    layer_dims = [(w.shape[1], w.shape[0]) for (w, _) in params]
    flops = 2 * N * HW * sum(cin * cout for cin, cout in layer_dims)
    bytes_accessed = N * HW * (C + nc_out) * x_nchw.dtype.itemsize + sum(
        w.size * w.dtype.itemsize + b.size * b.dtype.itemsize for (w, b) in params
    )

    out3d = pl.pallas_call(
        _make_kernel(len(params), chunk, num_chunks),
        out_shape=jax.ShapeDtypeStruct((N, nc_out, HW), x_nchw.dtype),
        grid=(N, HW // tile_hw),
        in_specs=in_specs,
        out_specs=pl.BlockSpec((None, nc_out, tile_hw), lambda n, j: (n, 0, j)),
        compiler_params=pltpu.CompilerParams(
            dimension_semantics=("parallel", "parallel")
        ),
        cost_estimate=pl.CostEstimate(
            flops=int(flops), transcendentals=0, bytes_accessed=int(bytes_accessed)
        ),
    )(*args)

    # Free view back: (N, nc, H*W) -> NCHW.
    return out3d.reshape(N, nc_out, H, W)


def _reference_forward(x_nchw, params):
    """Pure-JAX reference of the PyTorch forward (for correctness check)."""
    N, C, H, W = x_nchw.shape
    h = x_nchw.reshape(N, C, H * W).astype(jnp.float32)
    for li, (w, b) in enumerate(params):
        h = jnp.einsum("oc,nci->noi", w, h) + b[None, :, :]
        if li < len(params) - 1:
            h = jnp.where(h > 0, h, 0.2 * h)
    return h.reshape(N, -1, H, W).astype(x_nchw.dtype)


if __name__ == "__main__":
    # Small shapes consistent with the module: ndf=8, nDep=2, nc=3
    ndf, nDep, nc = 8, 2, 3
    N, H, W = 2, 16, 16

    key = jax.random.PRNGKey(0)
    key, kx = jax.random.split(key)
    x = jax.random.normal(kx, (N, nc, H, W), jnp.float32)

    params = init_color_reconstruction_params(key, ndf, nDep, nc)
    params = tuple((jnp.asarray(w), jnp.asarray(b)) for (w, b) in params)

    out = color_reconstruction_pallas(x, params)
    out = jax.block_until_ready(out)

    ref = _reference_forward(x, params)
    assert out.shape == (N, nc, H, W)
    assert jnp.allclose(out, ref, atol=1e-5, rtol=1e-5)

    print("KERNEL_OK")
</pallas_src>

<mosaic_0001>
module attributes {stable_mosaic.version = 11 : i64} {
  func.func @kernel(%arg0: i32, %arg1: i32, %arg2: memref<1x3x256xf32, #tpu.memory_space<vmem>>, %arg3: memref<8x3xf32, #tpu.memory_space<vmem>>, %arg4: memref<8x1xf32, #tpu.memory_space<vmem>>, %arg5: memref<16x8xf32, #tpu.memory_space<vmem>>, %arg6: memref<16x1xf32, #tpu.memory_space<vmem>>, %arg7: memref<3x16xf32, #tpu.memory_space<vmem>>, %arg8: memref<3x1xf32, #tpu.memory_space<vmem>>, %arg9: memref<1x3x256xf32, #tpu.memory_space<vmem>>) attributes {dimension_semantics = [#tpu.dimension_semantics<parallel>, #tpu.dimension_semantics<parallel>], iteration_bounds = array<i64: 2, 1>, scalar_prefetch = 0 : i64, scratch_operands = 0 : i64, tpu.core_type = #tpu.core_type<tc>, window_params = [{transform_indices = @transform_0, window_bounds = array<i64: 1, 3, 256>}, {pipeline_mode = #tpu.pipeline_mode<synchronous>, transform_indices = @transform_1, window_bounds = array<i64: 8, 3>}, {pipeline_mode = #tpu.pipeline_mode<synchronous>, transform_indices = @transform_2, window_bounds = array<i64: 8, 1>}, {pipeline_mode = #tpu.pipeline_mode<synchronous>, transform_indices = @transform_3, window_bounds = array<i64: 16, 8>}, {pipeline_mode = #tpu.pipeline_mode<synchronous>, transform_indices = @transform_4, window_bounds = array<i64: 16, 1>}, {pipeline_mode = #tpu.pipeline_mode<synchronous>, transform_indices = @transform_5, window_bounds = array<i64: 3, 16>}, {pipeline_mode = #tpu.pipeline_mode<synchronous>, transform_indices = @transform_6, window_bounds = array<i64: 3, 1>}, {transform_indices = @transform_7, window_bounds = array<i64: 1, 3, 256>}]} {
    %c0 = arith.constant 0 : index
    %c0_0 = arith.constant 0 : index
    %0 = vector.load %arg3[%c0, %c0_0] : memref<8x3xf32, #tpu.memory_space<vmem>>, vector<8x3xf32>
    %c0_1 = arith.constant 0 : index
    %c0_2 = arith.constant 0 : index
    %1 = vector.load %arg5[%c0_1, %c0_2] : memref<16x8xf32, #tpu.memory_space<vmem>>, vector<16x8xf32>
    %c0_3 = arith.constant 0 : index
    %c0_4 = arith.constant 0 : index
    %2 = vector.load %arg7[%c0_3, %c0_4] : memref<3x16xf32, #tpu.memory_space<vmem>>, vector<3x16xf32>
    %c0_5 = arith.constant 0 : index
    %c0_6 = arith.constant 0 : index
    %3 = vector.load %arg4[%c0_5, %c0_6] : memref<8x1xf32, #tpu.memory_space<vmem>>, vector<8x1xf32>
    %c0_7 = arith.constant 0 : index
    %c0_8 = arith.constant 0 : index
    %4 = vector.load %arg6[%c0_7, %c0_8] : memref<16x1xf32, #tpu.memory_space<vmem>>, vector<16x1xf32>
    %c0_9 = arith.constant 0 : index
    %c0_10 = arith.constant 0 : index
    %5 = vector.load %arg8[%c0_9, %c0_10] : memref<3x1xf32, #tpu.memory_space<vmem>>, vector<3x1xf32>
    %c0_11 = arith.constant 0 : index
    %c0_12 = arith.constant 0 : index
    %c0_13 = arith.constant 0 : index
    %6 = vector.load %arg2[%c0_11, %c0_12, %c0_13] : memref<1x3x256xf32, #tpu.memory_space<vmem>>, vector<1x3x256xf32>
    %7 = vector.shape_cast %6 : vector<1x3x256xf32> to vector<3x256xf32>
    %cst = arith.constant dense<0.000000e+00> : vector<8x256xf32>
    %8 = tpu.matmul %0, %7, %cst {dimension_numbers = #tpu.dot_dimension_numbers<[1], [0], [0], [1], [0, 0, 1, 1], [], []>} : vector<8x3xf32>, vector<3x256xf32>, vector<8x256xf32> -> vector<8x256xf32>
    %9 = vector.broadcast %3 : vector<8x1xf32> to vector<8x256xf32>
    %10 = arith.addf %8, %9 : vector<8x256xf32>
    %cst_14 = arith.constant 0.000000e+00 : f32
    %11 = vector.broadcast %cst_14 : f32 to vector<8x256xf32>
    %12 = arith.cmpf ogt, %10, %11 : vector<8x256xf32>
    %cst_15 = arith.constant 2.000000e-01 : f32
    %13 = vector.broadcast %cst_15 : f32 to vector<8x256xf32>
    %14 = arith.mulf %13, %10 : vector<8x256xf32>
    %15 = arith.select %12, %10, %14 : vector<8x256xi1>, vector<8x256xf32>
    %cst_16 = arith.constant dense<0.000000e+00> : vector<16x256xf32>
    %16 = tpu.matmul %1, %15, %cst_16 {dimension_numbers = #tpu.dot_dimension_numbers<[1], [0], [0], [1], [0, 0, 1, 1], [], []>} : vector<16x8xf32>, vector<8x256xf32>, vector<16x256xf32> -> vector<16x256xf32>
    %17 = vector.broadcast %4 : vector<16x1xf32> to vector<16x256xf32>
    %18 = arith.addf %16, %17 : vector<16x256xf32>
    %cst_17 = arith.constant 0.000000e+00 : f32
    %19 = vector.broadcast %cst_17 : f32 to vector<16x256xf32>
    %20 = arith.cmpf ogt, %18, %19 : vector<16x256xf32>
    %cst_18 = arith.constant 2.000000e-01 : f32
    %21 = vector.broadcast %cst_18 : f32 to vector<16x256xf32>
    %22 = arith.mulf %21, %18 : vector<16x256xf32>
    %23 = arith.select %20, %18, %22 : vector<16x256xi1>, vector<16x256xf32>
    %cst_19 = arith.constant dense<0.000000e+00> : vector<3x256xf32>
    %24 = tpu.matmul %2, %23, %cst_19 {dimension_numbers = #tpu.dot_dimension_numbers<[1], [0], [0], [1], [0, 0, 1, 1], [], []>} : vector<3x16xf32>, vector<16x256xf32>, vector<3x256xf32> -> vector<3x256xf32>
    %25 = vector.broadcast %5 : vector<3x1xf32> to vector<3x256xf32>
    %26 = arith.addf %24, %25 : vector<3x256xf32>
    %c0_20 = arith.constant 0 : index
    %c0_21 = arith.constant 0 : index
    %c0_22 = arith.constant 0 : index
    %27 = vector.load %arg9[%c0_20, %c0_21, %c0_22] : memref<1x3x256xf32, #tpu.memory_space<vmem>>, vector<1x3x256xf32>
    %28 = vector.shape_cast %27 : vector<1x3x256xf32> to vector<3x256xf32>
    %29 = vector.shape_cast %26 : vector<3x256xf32> to vector<1x3x256xf32>
    tpu.vector_store %arg9[%c0_20, %c0_21, %c0_22], %29 {strides = array<i32>} : memref<1x3x256xf32, #tpu.memory_space<vmem>>, vector<1x3x256xf32>,
    return
  }
  func.func @transform_0(%arg0: i32, %arg1: i32) -> (i32, i32, i32) {
    %c0_i32 = arith.constant 0 : i32
    %c0_i32_0 = arith.constant 0 : i32
    return %arg0, %c0_i32, %arg1 : i32, i32, i32
  }
  func.func @transform_1(%arg0: i32, %arg1: i32) -> (i32, i32) {
    %c0_i32 = arith.constant 0 : i32
    %c0_i32_0 = arith.constant 0 : i32
    %c0_i32_1 = arith.constant 0 : i32
    return %c0_i32, %c0_i32_0 : i32, i32
  }
  func.func @transform_2(%arg0: i32, %arg1: i32) -> (i32, i32) {
    %c0_i32 = arith.constant 0 : i32
    %c0_i32_0 = arith.constant 0 : i32
    %c0_i32_1 = arith.constant 0 : i32
    return %c0_i32, %c0_i32_0 : i32, i32
  }
  func.func @transform_3(%arg0: i32, %arg1: i32) -> (i32, i32) {
    %c0_i32 = arith.constant 0 : i32
    %c0_i32_0 = arith.constant 0 : i32
    %c0_i32_1 = arith.constant 0 : i32
    return %c0_i32, %c0_i32_0 : i32, i32
  }
  func.func @transform_4(%arg0: i32, %arg1: i32) -> (i32, i32) {
    %c0_i32 = arith.constant 0 : i32
    %c0_i32_0 = arith.constant 0 : i32
    %c0_i32_1 = arith.constant 0 : i32
    return %c0_i32, %c0_i32_0 : i32, i32
  }
  func.func @transform_5(%arg0: i32, %arg1: i32) -> (i32, i32) {
    %c0_i32 = arith.constant 0 : i32
    %c0_i32_0 = arith.constant 0 : i32
    %c0_i32_1 = arith.constant 0 : i32
    return %c0_i32, %c0_i32_0 : i32, i32
  }
  func.func @transform_6(%arg0: i32, %arg1: i32) -> (i32, i32) {
    %c0_i32 = arith.constant 0 : i32
    %c0_i32_0 = arith.constant 0 : i32
    %c0_i32_1 = arith.constant 0 : i32
    return %c0_i32, %c0_i32_0 : i32, i32
  }
  func.func @transform_7(%arg0: i32, %arg1: i32) -> (i32, i32, i32) {
    %c0_i32 = arith.constant 0 : i32
    %c0_i32_0 = arith.constant 0 : i32
    return %arg0, %c0_i32, %arg1 : i32, i32, i32
  }
}

</mosaic_0001>

<bundles_post_ra>
// kernel: color_reconstruction_pallas.1
= control target key start
LH: loop header
LB: loop body
LE: loop exit
PB: predicated region body
PF: predicated region fallthrough
CT: control target
= control target key end

     0   :  { %s816_s24 = smov 0   ;;  %s818_s25 = smov 0   ;;  %s880_s0 = inlined_call_operand.vmem [shape: f32[2,3,256], index: 0, kind: input, shape index: {}]   ;;  %s881_s1 = inlined_call_operand.vmem [shape: f32[8,3], index: 1, kind: input, shape index: {}]   ;;  %s882_s2 = inlined_call_operand.vmem [shape: f32[8,1], index: 2, kind: input, shape index: {}]   ;;  %s883_s3 = inlined_call_operand.vmem [shape: f32[16,8], index: 3, kind: input, shape index: {}]   ;;  %s884_s4 = inlined_call_operand.vmem [shape: f32[16,1], index: 4, kind: input, shape index: {}]   ;;  %s885_s5 = inlined_call_operand.vmem [shape: f32[3,16], index: 5, kind: input, shape index: {}]   ;;  %s886_s6 = inlined_call_operand.vmem [shape: f32[3,1], index: 6, kind: input, shape index: {}]   ;;  %s887_s7 = inlined_call_operand.vmem [shape: f32[2,3,256], index: 7, kind: output, shape index: {}]  }
   0x1   :  { %s820_s26 = smov 0  }
   0x2 LB: > { %s29_s27 = sadd.s32 1, %s768_s25  ;;  %p702_p0 = scmp.ge.s32.totalorder %s772_s26, 1  ;;  %s772_s26 = sphi %s820_s26, %s17_s26   ;;  %s768_s25 = sphi %s818_s25, %s889_s25   ;;  %s764_s24 = sphi %s816_s24, %s888_s24  }
   0x3   : > { %p31_p1 = scmp.ge.s32.totalorder %s29_s27, 2  ;;  %p258_p2 = scmp.lt.s32.totalorder %s772_s26, 3 }
   0x5   : > { %s891_s27 = smov (%p31_p1, %s29_s27), 0  ;;  %p259_p3 = pnand %p702_p0, %p258_p2 }
   0x6   : > { %p299_p4 = scmp.lt.s32.totalorder (!%p259_p3), %s764_s24, 1  ;;  %v774_v0 = vmov (!%p259_p3), 0.0   ;;  %v775_v1 = vmov (!%p259_p3), 0   ;;  %v322_v2 = vld [vmem:[%s882_s2] sm:$0xff] (!%p259_p3)  ;;  %vm338_vm0 = vcmask (!%p259_p3), 1042432   ;;  %vm334_vm1 = vcmask (!%p259_p3), 23552  }
   0x7   : > { %262 = sbr.rel (%p259_p3) target bundleno = 688 (0x2b0), region = 48  ;;  %407 = vmatprep.mubr.f32.mxu0 (!%p259_p3), %v774_v0  ;;  %747 = vset.pattern.permute.xlu0 (!%p259_p3), %v775_v1  ;;  %v323_v3 = vld [vmem:[%s884_s4] sm:$0xff] (!%p259_p3)  ;;  %v324_v7 = vld [vmem:[%s884_s4 + $0x8] sm:$0xff] (!%p259_p3)  ;;  %vm430_vm4 = vcmask (!%p259_p3), 64512   ;;  %vm531_vm9 = vcmask (!%p259_p3), 130048  }
   0x8   : > { %329 = vperm.xlu0 (!%p259_p3), %747, %v322_v2   ;;  %501 = vmatprep.mubr.f32.mxu1 (!%p259_p3), %v774_v0  ;;  %v318_v6 = vld [vmem:[%s881_s1] sm:$0xff] (!%p259_p3)  ;;  %v320_v19 = vld [vmem:[%s883_s3 + $0x8] sm:$0xff] (!%p259_p3) }
   0x9   : > { %748 = vset.pattern.permute.xlu1 (!%p259_p3), %v775_v1  ;;  %v325_v8 = vld [vmem:[%s886_s6] sm:$0x7] (!%p259_p3) }
   0xa   : > { %427 = vperm.xlu1 (!%p259_p3), %748, %v324_v7   ;;  %v319_v17 = vld [vmem:[%s883_s3] sm:$0xff] (!%p259_p3) }
   0xb   : > { %v321_v40 = vld [vmem:[%s885_s5] sm:$0x7] (!%p259_p3) }
   0xc   : > { %422 = vperm.xlu0 (!%p259_p3), %747, %v323_v3  }
   0xe   : > { %s893_s24 = smov (!%p299_p4, %s764_s24), 1  ;;  %528 = vperm.xlu1 %748, %v325_v8  }
   0xf   : > { %s715_s9 = sshll.u32 %s893_s24, 3 }
  0x10   : > { %s306_s12 = scalar_lea.vmem %s880_s0, %s715_s9  ;;  %s316_s8 = scalar_lea.vmem %s887_s7, %s715_s9 }
  0x11   : > { %v326_v4 = vld [vmem:[%s306_s12] sm:$0x77] }
  0x12   : > { %v333_v5 = vcombine.high %v326_v4, %v326_v4 }
  0x14   : > { %707 = vmatprep.subr.msk.mxu0 %vm338_vm0, %v333_v5 }
  0x15   : > { %708 = vmatpush1.msk.msra.mxu0 %vm338_vm0, %v326_v4 }
  0x16   : > { %709 = vmatmul.mubr.msk.f32.vlgmr.msra.gmra.mrb[0].mxu0 %vm334_vm1, %v318_v6 }
  0x17   : > { %599 = vmatprep.mubr.f32.mxu0 %v774_v0 }
  0x87   : > { %v330_v9 = vpop.permute.xlu0 %329 }
  0x89   : > { %v428_v25 = vpop.permute.xlu1 %427 }
  0x8b   : > { %v423_v20 = vpop.permute.xlu0 %422 }
  0x8d   : > { %v529_v41 = vpop.permute.xlu1 %528 }
  0xe9   : > { %v409_v10 = vpop.f32.mrb[0].mxu0 }
  0xea   : > { %v410_v11 = vadd.f32 %v409_v10, %v330_v9  ;;  %v411_v12 = vpop.f32.mrb[1].mxu0 }
  0xeb   : > { %v412_v13 = vadd.f32 %v411_v12, %v330_v9 }
  0xec   : > { %v416_v14 = vmul.f32 0.2, %v410_v11  ;;  %vm414_vm3 = vcmp.gt.f32.partialorder %v410_v11, 0.0 }
  0xed   : > { %vm415_vm2 = vcmp.gt.f32.partialorder %v412_v13, 0.0  ;;  %v417_v15 = vmul.f32 0.2, %v412_v13 }
  0xee   : > { %v418_v18 = vsel %vm414_vm3, %v410_v11, %v416_v14 }
  0xef   : > { %v419_v16 = vsel %vm415_vm2, %v412_v13, %v417_v15 }
  0xf0   : > { %437 = vmatprep.subr.mxu1 %v419_v16 }
  0xf1   : > { %438 = vmatpush1.msra.mxu1 %v418_v18 }
  0xf2   : > { %710 = vmatmul.mubr.msk.f32.vlgmr.msra.gmra.mrb[0].mxu1 %vm430_vm4, %v319_v17 }
  0xf3   : > { %507 = vmatprep.mubr.f32.mxu1 %v774_v0 }
  0xf6   : > { %711 = vmatmul.mubr.msk.f32.gmra.mrb[2].mxu1 %vm430_vm4, %v320_v19 }
 0x1c5   : > { %v503_v21 = vpop.f32.mrb[0].mxu1 }
 0x1c6   : > { %v504_v22 = vadd.f32 %v503_v21, %v423_v20  ;;  %v505_v23 = vpop.f32.mrb[1].mxu1 }
 0x1c7   : > { %v506_v24 = vadd.f32 %v505_v23, %v423_v20 }
 0x1c8   : > { %v518_v27 = vmul.f32 0.2, %v504_v22  ;;  %vm514_vm5 = vcmp.gt.f32.partialorder %v504_v22, 0.0 }
 0x1c9   : > { %v509_v26 = vpop.f32.mrb[2].mxu1  ;;  %v519_v30 = vmul.f32 0.2, %v506_v24  ;;  %vm515_vm6 = vcmp.gt.f32.partialorder %v506_v24, 0.0 }
 0x1ca   : > { %v510_v28 = vadd.f32 %v509_v26, %v428_v25  ;;  %v511_v29 = vpop.f32.mrb[3].mxu1  ;;  %v522_v34 = vsel %vm514_vm5, %v504_v22, %v518_v27 }
 0x1cb   : > { %v512_v31 = vadd.f32 %v511_v29, %v428_v25  ;;  %v523_v37 = vsel %vm515_vm6, %v506_v24, %v519_v30 }
 0x1cc   : > { %vm516_vm7 = vcmp.gt.f32.partialorder %v510_v28, 0.0  ;;  %v520_v32 = vmul.f32 0.2, %v510_v28 }
 0x1cd   : > { %vm517_vm8 = vcmp.gt.f32.partialorder %v512_v31, 0.0  ;;  %v521_v33 = vmul.f32 0.2, %v512_v31 }
 0x1ce   : > { %v524_v35 = vsel %vm516_vm7, %v510_v28, %v520_v32 }
 0x1cf   : > { %v719_v36 = vpack.c.bf16 %v524_v35, %v522_v34  ;;  %v525_v38 = vsel %vm517_vm8, %v512_v31, %v521_v33 }
 0x1d0   : > { %v717_v39 = vpack.c.bf16 %v525_v38, %v523_v37 }
 0x1d2   : > { %718 = vmatprep.subr.bf16.mxu0 %v717_v39 }
 0x1d3   : > { %720 = vmatpush1.bf16.msra.mxu0 %v719_v36 }
 0x1d6   : > { %712 = vmatmul.mubr.msk.f32.vlgmr.msra.gmra.mrb[2].mxu0 %vm531_vm9, %v321_v40 }
 0x2a9   : > { %v601_v42 = vpop.f32.mrb[2].mxu0 }
 0x2aa   : > { %v602_v43 = vadd.f32 %v601_v42, %v529_v41  ;;  %v603_v44 = vpop.f32.mrb[3].mxu0 }
 0x2ab   : > { %v604_v45 = vadd.f32 %v603_v44, %v529_v41 }
 0x2ad   : > { %v608_v46 = vcombine.low %v602_v43, %v604_v45 }
 0x2af   : > { %610 = vst [vmem:[%s316_s8] sm:$0x77] %v608_v46 }
 0x2b0 PF: > { %s17_s26 = sadd.s32 1, %s772_s26   ;;  %s888_s24 = smov %s768_s25 }
 0x2b1   : > { %p14_p5 = scmp.ge.s32.totalorder %s17_s26, 4   ;;  %s889_s25 = smov %s891_s27 }
 0x2b3   :  { %16 = sbr.rel (!%p14_p5) target bundleno = 2 (0x2), region = 78 }

</bundles_post_ra>
